<compile_context>
chip_gen: v7x
topology: tpu7x:2x2x1
jax: 0.10.0
libtpu: 0.0.40
codegen_flags: <defaults>
</compile_context>

<pallas_src>
import functools

import jax
import jax.numpy as jnp
from jax.experimental import pallas as pl
from jax.experimental.pallas import tpu as pltpu

LANE = 128      # vreg lane width: output feature dims padded to a multiple of this
SUBLANE = 8     # batch tile must be a multiple of this


def _round_up(n, m):
    return ((n + m - 1) // m) * m


def child_classifier_kernel(x_ref, wfc_ref, bfc_ref, wproj_ref, bproj_ref,
                            ln_ref, proj_ref, *, true_c):
    # ---- fc: bf16 MXU matmul, f32 accumulation ----
    x = x_ref[...].astype(jnp.bfloat16)                       # [TB, D]
    h = jnp.dot(x, wfc_ref[...],
                preferred_element_type=jnp.float32)           # [TB, Cp] f32
    h = h + bfc_ref[...]                                      # f32 bias

    cp = h.shape[-1]
    if true_c != cp:
        col = jax.lax.broadcasted_iota(jnp.int32, h.shape, 1)
        mask = col < true_c
        h_stat = jnp.where(mask, h, 0.0)
    else:
        mask = None
        h_stat = h

    # ---- layer_norm over the true C (no affine, eps=1e-5, biased variance),
    #      one-pass stats: var = E[h^2] - mean^2 ----
    inv_c = 1.0 / float(true_c)
    mean = jnp.sum(h_stat, axis=-1, keepdims=True) * inv_c
    ex2 = jnp.sum(h_stat * h_stat, axis=-1, keepdims=True) * inv_c
    var = ex2 - mean * mean
    ln = (h - mean) * jax.lax.rsqrt(var + 1e-5)
    if mask is not None:
        ln = jnp.where(mask, ln, 0.0)                         # keep pad lanes zero
    ln_ref[...] = ln.astype(ln_ref.dtype)

    # ---- proj: dropout(eval) is identity; bf16 MXU matmul, f32 accumulation ----
    proj = jnp.dot(ln.astype(jnp.bfloat16), wproj_ref[...],
                   preferred_element_type=jnp.float32) + bproj_ref[...]
    proj_ref[...] = proj.astype(proj_ref.dtype)


def prepare_params(w_fc, b_fc, w_proj, b_proj):
    """One-time parameter prep: zero-pad the output feature dims (C, P) up to a
    multiple of 128 lanes; store matmul weights as bf16, biases as f32."""
    _, C = w_fc.shape
    _, P = w_proj.shape
    Cp, Pp = _round_up(C, LANE), _round_up(P, LANE)
    return {
        "w_fc": jnp.pad(w_fc, ((0, 0), (0, Cp - C))).astype(jnp.bfloat16),
        "b_fc": jnp.pad(b_fc.reshape(1, -1), ((0, 0), (0, Cp - C))).astype(jnp.float32),
        "w_proj": jnp.pad(w_proj, ((0, Cp - C), (0, Pp - P))).astype(jnp.bfloat16),
        "b_proj": jnp.pad(b_proj.reshape(1, -1), ((0, 0), (0, Pp - P))).astype(jnp.float32),
        "num_children": C,
        "proj_embed_dim": P,
    }


def child_classifier_forward(x, params, *, batch_tile=256):
    """x: [B, input_dim] f32.  Returns (ln [B, C] f32, proj [B, P] f32)."""
    B, D = x.shape
    C = params["num_children"]
    P = params["proj_embed_dim"]
    w_fc, b_fc = params["w_fc"], params["b_fc"]
    w_proj, b_proj = params["w_proj"], params["b_proj"]
    Cp = w_fc.shape[1]
    Pp = w_proj.shape[1]

    # Batch tile: multiple of 8 sublanes; pad B up to a multiple of the tile so
    # every grid step is full (zero rows are harmless: eps keeps LN finite).
    TB = min(batch_tile, _round_up(B, SUBLANE))
    Bp = _round_up(B, TB)
    xp = jnp.pad(x, ((0, Bp - B), (0, 0))) if Bp != B else x

    kernel = functools.partial(child_classifier_kernel, true_c=C)

    ln_p, proj_p = pl.pallas_call(
        kernel,
        out_shape=(
            jax.ShapeDtypeStruct((Bp, Cp), jnp.float32),
            jax.ShapeDtypeStruct((Bp, Pp), jnp.float32),
        ),
        grid=(Bp // TB,),
        in_specs=[
            pl.BlockSpec((TB, D), lambda i: (i, 0)),        # x: streamed per tile
            pl.BlockSpec((D, Cp), lambda i: (0, 0)),        # w_fc: VMEM-resident
            pl.BlockSpec((1, Cp), lambda i: (0, 0)),        # b_fc: VMEM-resident
            pl.BlockSpec((Cp, Pp), lambda i: (0, 0)),       # w_proj: VMEM-resident
            pl.BlockSpec((1, Pp), lambda i: (0, 0)),        # b_proj: VMEM-resident
        ],
        out_specs=(
            pl.BlockSpec((TB, Cp), lambda i: (i, 0)),
            pl.BlockSpec((TB, Pp), lambda i: (i, 0)),
        ),
        compiler_params=pltpu.CompilerParams(
            dimension_semantics=("parallel",)),
    )(xp, w_fc, b_fc, w_proj, b_proj)

    return ln_p[:B, :C], proj_p[:B, :P]


def init_params(key, input_dim, proj_embed_dim, num_children):
    """Deterministic init mirroring the module: trunc_normal(std=2e-5) weights,
    zero biases.  Weights stored transposed: [in, out]."""
    k_fc, k_proj = jax.random.split(key)
    std = 2e-5
    w_fc = jax.random.truncated_normal(
        k_fc, -2.0, 2.0, (input_dim, num_children), jnp.float32) * std
    w_proj = jax.random.truncated_normal(
        k_proj, -2.0, 2.0, (num_children, proj_embed_dim), jnp.float32) * std
    b_fc = jnp.zeros((num_children,), jnp.float32)
    b_proj = jnp.zeros((proj_embed_dim,), jnp.float32)
    return w_fc, b_fc, w_proj, b_proj


def reference_forward(x, w_fc, b_fc, w_proj, b_proj):
    """Pure-JAX reference with the same bf16 parameter/matmul-input quantization
    the kernel uses; LayerNorm math in f32 (two-pass biased variance)."""
    xb = x.astype(jnp.bfloat16).astype(jnp.float32)
    wfc = w_fc.astype(jnp.bfloat16).astype(jnp.float32)
    wpj = w_proj.astype(jnp.bfloat16).astype(jnp.float32)
    h = xb @ wfc + b_fc.reshape(1, -1)
    mean = jnp.mean(h, axis=-1, keepdims=True)
    var = jnp.mean((h - mean) ** 2, axis=-1, keepdims=True)
    ln = (h - mean) * jax.lax.rsqrt(var + 1e-5)
    proj = ln @ wpj + b_proj.reshape(1, -1)
    return ln, proj


if __name__ == "__main__":
    B, input_dim, num_children, proj_embed_dim = 16, 32, 16, 32

    key = jax.random.PRNGKey(0)
    k_x, k_p = jax.random.split(key)
    x = jax.random.normal(k_x, (B, input_dim), jnp.float32)
    w_fc, b_fc, w_proj, b_proj = init_params(k_p, input_dim, proj_embed_dim,
                                             num_children)
    params = prepare_params(w_fc, b_fc, w_proj, b_proj)

    ln, proj = child_classifier_forward(x, params)
    jax.block_until_ready((ln, proj))

    ln_ref, proj_ref = reference_forward(x, w_fc, b_fc, w_proj, b_proj)
    assert ln.shape == (B, num_children) and proj.shape == (B, proj_embed_dim)
    assert jnp.allclose(ln, ln_ref, atol=1e-4, rtol=1e-3), \
        float(jnp.max(jnp.abs(ln - ln_ref)))
    assert jnp.allclose(proj, proj_ref, atol=1e-5, rtol=1e-3), \
        float(jnp.max(jnp.abs(proj - proj_ref)))

    print("KERNEL_OK")
</pallas_src>

<mosaic_0001>
module attributes {stable_mosaic.version = 11 : i64} {
  func.func @child_classifier_kernel(%arg0: i32, %arg1: memref<16x32xf32, #tpu.memory_space<vmem>>, %arg2: memref<32x128xbf16, #tpu.memory_space<vmem>>, %arg3: memref<1x128xf32, #tpu.memory_space<vmem>>, %arg4: memref<128x128xbf16, #tpu.memory_space<vmem>>, %arg5: memref<1x128xf32, #tpu.memory_space<vmem>>, %arg6: memref<16x128xf32, #tpu.memory_space<vmem>>, %arg7: memref<16x128xf32, #tpu.memory_space<vmem>>) attributes {dimension_semantics = [#tpu.dimension_semantics<parallel>], iteration_bounds = array<i64: 1>, scalar_prefetch = 0 : i64, scratch_operands = 0 : i64, tpu.core_type = #tpu.core_type<tc>, window_params = [{transform_indices = @transform_0, window_bounds = array<i64: 16, 32>}, {pipeline_mode = #tpu.pipeline_mode<synchronous>, transform_indices = @transform_1, window_bounds = array<i64: 32, 128>}, {pipeline_mode = #tpu.pipeline_mode<synchronous>, transform_indices = @transform_2, window_bounds = array<i64: 1, 128>}, {pipeline_mode = #tpu.pipeline_mode<synchronous>, transform_indices = @transform_3, window_bounds = array<i64: 128, 128>}, {pipeline_mode = #tpu.pipeline_mode<synchronous>, transform_indices = @transform_4, window_bounds = array<i64: 1, 128>}, {transform_indices = @transform_5, window_bounds = array<i64: 16, 128>}, {transform_indices = @transform_6, window_bounds = array<i64: 16, 128>}]} {
    %c0 = arith.constant 0 : index
    %c0_0 = arith.constant 0 : index
    %0 = vector.load %arg1[%c0, %c0_0] : memref<16x32xf32, #tpu.memory_space<vmem>>, vector<16x32xf32>
    %1 = arith.truncf %0 : vector<16x32xf32> to vector<16x32xbf16>
    %c0_1 = arith.constant 0 : index
    %c0_2 = arith.constant 0 : index
    %2 = vector.load %arg2[%c0_1, %c0_2] : memref<32x128xbf16, #tpu.memory_space<vmem>>, vector<32x128xbf16>
    %cst = arith.constant dense<0.000000e+00> : vector<16x128xf32>
    %3 = tpu.matmul %1, %2, %cst {dimension_numbers = #tpu.dot_dimension_numbers<[1], [0], [0], [1], [0, 0, 1, 1], [], []>} : vector<16x32xbf16>, vector<32x128xbf16>, vector<16x128xf32> -> vector<16x128xf32>
    %c0_3 = arith.constant 0 : index
    %c0_4 = arith.constant 0 : index
    %4 = vector.load %arg3[%c0_3, %c0_4] : memref<1x128xf32, #tpu.memory_space<vmem>>, vector<1x128xf32>
    %5 = vector.broadcast %4 : vector<1x128xf32> to vector<16x128xf32>
    %6 = arith.addf %3, %5 : vector<16x128xf32>
    %7 = tpu.iota {dimensions = array<i32: 1>} : vector<16x128xi32>
    %c16_i32 = arith.constant 16 : i32
    %8 = vector.broadcast %c16_i32 : i32 to vector<16x128xi32>
    %9 = arith.cmpi slt, %7, %8 : vector<16x128xi32>
    %cst_5 = arith.constant 0.000000e+00 : f32
    %10 = vector.broadcast %cst_5 : f32 to vector<16x128xf32>
    %11 = arith.select %9, %6, %10 : vector<16x128xi1>, vector<16x128xf32>
    %cst_6 = arith.constant dense<0.000000e+00> : vector<16xf32>
    %12 = vector.multi_reduction <add>, %11, %cst_6 [1] : vector<16x128xf32> to vector<16xf32>
    %13 = vector.shape_cast %12 : vector<16xf32> to vector<16x1xf32>
    %cst_7 = arith.constant 6.250000e-02 : f32
    %14 = vector.broadcast %cst_7 : f32 to vector<16x1xf32>
    %15 = arith.mulf %13, %14 : vector<16x1xf32>
    %16 = arith.mulf %11, %11 : vector<16x128xf32>
    %cst_8 = arith.constant dense<0.000000e+00> : vector<16xf32>
    %17 = vector.multi_reduction <add>, %16, %cst_8 [1] : vector<16x128xf32> to vector<16xf32>
    %18 = vector.shape_cast %17 : vector<16xf32> to vector<16x1xf32>
    %cst_9 = arith.constant 6.250000e-02 : f32
    %19 = vector.broadcast %cst_9 : f32 to vector<16x1xf32>
    %20 = arith.mulf %18, %19 : vector<16x1xf32>
    %21 = arith.mulf %15, %15 : vector<16x1xf32>
    %22 = arith.subf %20, %21 : vector<16x1xf32>
    %23 = vector.broadcast %15 : vector<16x1xf32> to vector<16x128xf32>
    %24 = arith.subf %6, %23 : vector<16x128xf32>
    %cst_10 = arith.constant 9.99999974E-6 : f32
    %25 = vector.broadcast %cst_10 : f32 to vector<16x1xf32>
    %26 = arith.addf %22, %25 : vector<16x1xf32>
    %27 = math.rsqrt %26 : vector<16x1xf32>
    %28 = vector.broadcast %27 : vector<16x1xf32> to vector<16x128xf32>
    %29 = arith.mulf %24, %28 : vector<16x128xf32>
    %cst_11 = arith.constant 0.000000e+00 : f32
    %30 = vector.broadcast %cst_11 : f32 to vector<16x128xf32>
    %31 = arith.select %9, %29, %30 : vector<16x128xi1>, vector<16x128xf32>
    %c0_12 = arith.constant 0 : index
    %c0_13 = arith.constant 0 : index
    %32 = vector.load %arg6[%c0_12, %c0_13] : memref<16x128xf32, #tpu.memory_space<vmem>>, vector<16x128xf32>
    tpu.vector_store %arg6[%c0_12, %c0_13], %31 {strides = array<i32>} : memref<16x128xf32, #tpu.memory_space<vmem>>, vector<16x128xf32>,
    %33 = arith.truncf %31 : vector<16x128xf32> to vector<16x128xbf16>
    %c0_14 = arith.constant 0 : index
    %c0_15 = arith.constant 0 : index
    %34 = vector.load %arg4[%c0_14, %c0_15] : memref<128x128xbf16, #tpu.memory_space<vmem>>, vector<128x128xbf16>
    %cst_16 = arith.constant dense<0.000000e+00> : vector<16x128xf32>
    %35 = tpu.matmul %33, %34, %cst_16 {dimension_numbers = #tpu.dot_dimension_numbers<[1], [0], [0], [1], [0, 0, 1, 1], [], []>} : vector<16x128xbf16>, vector<128x128xbf16>, vector<16x128xf32> -> vector<16x128xf32>
    %c0_17 = arith.constant 0 : index
    %c0_18 = arith.constant 0 : index
    %36 = vector.load %arg5[%c0_17, %c0_18] : memref<1x128xf32, #tpu.memory_space<vmem>>, vector<1x128xf32>
    %37 = vector.broadcast %36 : vector<1x128xf32> to vector<16x128xf32>
    %38 = arith.addf %35, %37 : vector<16x128xf32>
    %c0_19 = arith.constant 0 : index
    %c0_20 = arith.constant 0 : index
    %39 = vector.load %arg7[%c0_19, %c0_20] : memref<16x128xf32, #tpu.memory_space<vmem>>, vector<16x128xf32>
    tpu.vector_store %arg7[%c0_19, %c0_20], %38 {strides = array<i32>} : memref<16x128xf32, #tpu.memory_space<vmem>>, vector<16x128xf32>,
    return
  }
  func.func @transform_0(%arg0: i32) -> (i32, i32) {
    %c0_i32 = arith.constant 0 : i32
    %c0_i32_0 = arith.constant 0 : i32
    return %arg0, %c0_i32 : i32, i32
  }
  func.func @transform_1(%arg0: i32) -> (i32, i32) {
    %c0_i32 = arith.constant 0 : i32
    %c0_i32_0 = arith.constant 0 : i32
    %c0_i32_1 = arith.constant 0 : i32
    return %c0_i32, %c0_i32_0 : i32, i32
  }
  func.func @transform_2(%arg0: i32) -> (i32, i32) {
    %c0_i32 = arith.constant 0 : i32
    %c0_i32_0 = arith.constant 0 : i32
    %c0_i32_1 = arith.constant 0 : i32
    return %c0_i32, %c0_i32_0 : i32, i32
  }
  func.func @transform_3(%arg0: i32) -> (i32, i32) {
    %c0_i32 = arith.constant 0 : i32
    %c0_i32_0 = arith.constant 0 : i32
    %c0_i32_1 = arith.constant 0 : i32
    return %c0_i32, %c0_i32_0 : i32, i32
  }
  func.func @transform_4(%arg0: i32) -> (i32, i32) {
    %c0_i32 = arith.constant 0 : i32
    %c0_i32_0 = arith.constant 0 : i32
    %c0_i32_1 = arith.constant 0 : i32
    return %c0_i32, %c0_i32_0 : i32, i32
  }
  func.func @transform_5(%arg0: i32) -> (i32, i32) {
    %c0_i32 = arith.constant 0 : i32
    %c0_i32_0 = arith.constant 0 : i32
    return %arg0, %c0_i32 : i32, i32
  }
  func.func @transform_6(%arg0: i32) -> (i32, i32) {
    %c0_i32 = arith.constant 0 : i32
    %c0_i32_0 = arith.constant 0 : i32
    return %arg0, %c0_i32 : i32, i32
  }
}

</mosaic_0001>

<bundles_post_ra>
// kernel: tpu_custom_call.1
= control target key start
LH: loop header
LB: loop body
LE: loop exit
PB: predicated region body
PF: predicated region fallthrough
CT: control target
= control target key end

     0   :  { %12 = vsyncpa [#allocation3], 0  ;;  %s661_s0 = inlined_call_operand.hbm [shape: f32[16,32], index: 0, kind: input, shape index: {}]   ;;  %s662_s1 = inlined_call_operand.hbm [shape: bf16[32,128], index: 1, kind: input, shape index: {}]   ;;  %s663_s2 = inlined_call_operand.vmem [shape: f32[1,128], index: 2, kind: input, shape index: {}]   ;;  %s664_s3 = inlined_call_operand.hbm [shape: bf16[128,128], index: 3, kind: input, shape index: {}]   ;;  %s665_s4 = inlined_call_operand.vmem [shape: f32[1,128], index: 4, kind: input, shape index: {}]   ;;  %s666_s5 = inlined_call_operand.hbm [shape: f32[16,128], index: 5, kind: output, shape index: {0}]   ;;  %s667_s6 = inlined_call_operand.hbm [shape: f32[16,128], index: 6, kind: output, shape index: {1}]  }
   0x1   :  { %13 = vsyncpa [#allocation6], 0 }
   0x2   :  { %14 = vsyncpa [#allocation4], 0 }
   0x3   :  { %15 = vsyncpa [#allocation10], 0  ;;  %s520_s21 = smov [#allocation5]   ;;  %s402_s25 = scalar_lea.hbm %s662_s1, 256 }
   0x4   :  { %s33_s22 = sshll.u32 %s520_s21, 4  ;;  %p403_p0 = scmp.ne.s32.totalorder %s662_s1, %s402_s25  ;;  %s34_s22 = int_to_ptr.vmem [resolvable:$true] %s33_s22 }
   0x5   :  { %p406_p1 = scmp.lt.u32.totalorder %s402_s25, %s662_s1 }
   0x7   :  { %p408_p2 = pnand %p406_p1, %p403_p0 }
   0x9   :  { %411 = shalt.err (!%p408_p2)
}
   0xa   :  { %s412_s30 = scalar_lea.vmem %s34_s22, 256  ;;  %p417_p4 = scmp.lt.s32.totalorder %s34_s22, %s34_s22 }
   0xb   :  { %p413_p3 = scmp.ne.s32.totalorder %s34_s22, %s412_s30  ;;  %p418_p5 = scmp.lt.s32.totalorder %s412_s30, %s412_s30 }
   0xd   :  { %p419_p6 = por %p418_p5, %p417_p4 }
   0xf   :  { %p420_p7 = pnand %p419_p6, %p413_p3 }
  0x11   :  { %423 = shalt.err (!%p420_p7)
}
  0x12   :  { %s521_s7 = smov 64   ;;  %s522_s8 = smov 4  }
  0x13   :  { %39 = dma.hbm_to_vmem [thread:$0]  %s662_s1, 256, %s34_s22, [#allocation6], %s521_s7, %s521_s7, %s522_s8  }
  0x14   :  { %s523_s11 = smov [#allocation2]   ;;  %s424_s15 = scalar_lea.hbm %s661_s0, 256 }
  0x15   :  { %s21_s12 = sshll.u32 %s523_s11, 4  ;;  %p425_p8 = scmp.ne.s32.totalorder %s661_s0, %s424_s15  ;;  %s22_s12 = int_to_ptr.vmem [resolvable:$true] %s21_s12 }
  0x16   :  { %p428_p9 = scmp.lt.u32.totalorder %s424_s15, %s661_s0 }
  0x18   :  { %p430_p10 = pnand %p428_p9, %p425_p8 }
  0x1a   :  { %433 = shalt.err (!%p430_p10)
}
  0x1b   :  { %s434_s20 = scalar_lea.vmem %s22_s12, 256  ;;  %p439_p12 = scmp.lt.s32.totalorder %s22_s12, %s22_s12 }
  0x1c   :  { %p435_p11 = scmp.ne.s32.totalorder %s22_s12, %s434_s20  ;;  %p440_p13 = scmp.lt.s32.totalorder %s434_s20, %s434_s20 }
  0x1e   :  { %p441_p0 = por %p440_p13, %p439_p12 }
  0x20   :  { %p442_p1 = pnand %p441_p0, %p435_p11 }
  0x22   :  { %445 = shalt.err (!%p442_p1)
}
  0x23   :  { %s524_s1 = smov 128   ;;  %s525_s21 = smov 8  }
  0x24   :  { %27 = dma.hbm_to_vmem [thread:$0]  %s661_s0, 256, %s22_s12, [#allocation3], %s524_s1, %s524_s1, %s525_s21  }
  0x25   :  { %s526_s24 = smov [#allocation7]   ;;  %s446_s28 = scalar_lea.hbm %s664_s3, 1024 }
  0x26   :  { %s47_s25 = sshll.u32 %s526_s24, 4  ;;  %p447_p2 = scmp.ne.s32.totalorder %s664_s3, %s446_s28  ;;  %s48_s25 = int_to_ptr.vmem [resolvable:$true] %s47_s25 }
  0x27   :  { %p450_p3 = scmp.lt.u32.totalorder %s446_s28, %s664_s3 }
  0x29   :  { %p452_p4 = pnand %p450_p3, %p447_p2 }
  0x2b   :  { %455 = shalt.err (!%p452_p4)
}
  0x2c   :  { %s456_s11 = scalar_lea.vmem %s48_s25, 1024  ;;  %p461_p6 = scmp.lt.s32.totalorder %s48_s25, %s48_s25 }
  0x2d   :  { %p457_p5 = scmp.ne.s32.totalorder %s48_s25, %s456_s11  ;;  %p462_p7 = scmp.lt.s32.totalorder %s456_s11, %s456_s11 }
  0x2f   :  { %p463_p8 = por %p462_p7, %p461_p6 }
  0x31   :  { %p464_p9 = pnand %p463_p8, %p457_p5 }
  0x33   :  { %467 = shalt.err (!%p464_p9)
}
  0x34   :  { %53 = dma.hbm_to_vmem [thread:$0]  %s664_s3, 1024, %s48_s25, [#allocation6], %s521_s7, %s521_s7, %s522_s8  }
  0x35   :  { %512 = dma.done.wait [#allocation3], 256  }
  0x36   :  { %513 = vsyncadd [#allocation3], 4294967040 }
  0x37   :  { %514 = dma.done.wait [#allocation6], 1280  }
  0x38   :  { %515 = vsyncadd [#allocation6], 4294966016  ;;  %v527_v0 = vmov 0.0   ;;  %vm528_vm0 = vmmov 0   ;;  %v388_v1 = vld [vmem:[#allocation5] sm:$0xff]   ;;  %v389_v2 = vld [vmem:[#allocation5 + $0x8] sm:$0xff]   ;;  %v137_v7 = vlaneseq }
  0x39   :  { %349 = vmatprep.subr.bf16.mxu0 %v527_v0  ;;  %353 = vmatprep.mubr.msk.bf16.mxu0 %vm528_vm0, %v527_v0  ;;  %v66_v3 = vld [vmem:[#allocation2] sm:$0xff]  ;;  %v67_v4 = vld [vmem:[#allocation2 + $0x8] sm:$0xff]  ;;  %vm92_vm1 = vcmask 261120   ;;  %v392_v21 = vld [vmem:[#allocation7 + $0x10] sm:$0xff]  }
  0x3a   :  { %357 = vmatprep.subr.bf16.mxu1 %v527_v0  ;;  %373 = vmatprep.mubr.msk.bf16.mxu1 %vm528_vm0, %v527_v0  ;;  %v68_v5 = vpack.c.bf16 %v67_v4, %v66_v3  ;;  %v390_v6 = vld [vmem:[#allocation7] sm:$0xff]   ;;  %v611_v8 = vand.u32 127, %v137_v7  ;;  %v391_v20 = vld [vmem:[#allocation7 + $0x8] sm:$0xff]   ;;  %v393_v22 = vld [vmem:[#allocation7 + $0x18] sm:$0xff]  }
  0x3b   :  { %350 = vmatpush3.bf16.msra.mxu0 %v388_v1  ;;  %358 = vmatpush3.bf16.msra.mxu1 %v390_v6  ;;  %v321_v9 = vld [vmem:[%s663_s2] ss:$0 sm:$0xff]  ;;  %v395_v24 = vld [vmem:[#allocation7 + $0x28] sm:$0xff]   ;;  %v396_v25 = vld [vmem:[#allocation7 + $0x30] sm:$0xff]   ;;  %s529_s2 = smov [#allocation8]  }
  0x3c   :  { %351 = vmatprep.subr.bf16.mxu0 %v527_v0  ;;  %359 = vmatprep.subr.bf16.mxu1 %v527_v0  ;;  %vm139_vm2 = vcmp.lt.s32.totalorder %v611_v8, 16  ;;  %v394_v23 = vld [vmem:[#allocation7 + $0x20] sm:$0xff]   ;;  %v397_v26 = vld [vmem:[#allocation7 + $0x38] sm:$0xff]   ;;  %s292_s8 = sshll.u32 %s529_s2, 4  ;;  %s293_s8 = int_to_ptr.vmem [resolvable:$true] %s292_s8 }
  0x3d   :  { %vm334_vm3 = vmpackc.low %vm139_vm2, %vm139_vm2  ;;  %s468_s13 = scalar_lea.vmem %s293_s8, 256  ;;  %p473_p11 = scmp.lt.s32.totalorder %s293_s8, %s293_s8 }
  0x3e   :  { %p469_p10 = scmp.ne.s32.totalorder %s293_s8, %s468_s13  ;;  %p474_p12 = scmp.lt.s32.totalorder %s468_s13, %s468_s13 }
  0x3f   :  { %352 = vmatpush3.bf16.msra.mxu0 %v389_v2  ;;  %360 = vmatpush3.bf16.msra.mxu1 %v391_v20 }
  0x40   :  { %361 = vmatprep.subr.bf16.mxu1 %v527_v0  ;;  %p475_p13 = por %p474_p12, %p473_p11 }
  0x42   :  { %354 = vmatmul.mubr.msk.bf16.vlgmr.msra.gmra.mrb[0].mxu0 %vm92_vm1, %v68_v5  ;;  %p476_p0 = pnand %p475_p13, %p469_p10 }
  0x43   :  { %362 = vmatpush3.bf16.msra.mxu1 %v392_v21 }
  0x44   :  { %363 = vmatprep.subr.bf16.mxu1 %v527_v0 }
  0x47   :  { %364 = vmatpush3.bf16.msra.mxu1 %v393_v22 }
  0x48   :  { %365 = vmatprep.subr.bf16.mxu1 %v527_v0 }
  0x4b   :  { %366 = vmatpush3.bf16.msra.mxu1 %v394_v23 }
  0x4c   :  { %367 = vmatprep.subr.bf16.mxu1 %v527_v0 }
  0x4f   :  { %368 = vmatpush3.bf16.msra.mxu1 %v395_v24 }
  0x50   :  { %369 = vmatprep.subr.bf16.mxu1 %v527_v0 }
  0x53   :  { %370 = vmatpush3.bf16.msra.mxu1 %v396_v25 }
  0x54   :  { %371 = vmatprep.subr.bf16.mxu1 %v527_v0 }
  0x57   :  { %372 = vmatpush3.bf16.msra.mxu1 %v397_v26 }
 0x115   :  { %v130_v10 = vpop.f32.mrb[0].mxu0 }
 0x116   :  { %v131_v11 = vadd.f32 %v321_v9, %v130_v10  ;;  %v355_v12 = vpop.f32.mrb[1].mxu0 }
 0x117   :  { %v133_v13 = vpop.f32.mrb[2].mxu0 }
 0x118   :  { %v134_v14 = vadd.f32 %v321_v9, %v133_v13  ;;  %v356_v15 = vpop.f32.mrb[3].mxu0  ;;  %v140_v16 = vsel %vm139_vm2, %v131_v11, 0.0 }
 0x119   :  { %142 = vadd.xlane.f32.xlu0 %v140_v16  ;;  %v148_v17 = vmul.f32 %v140_v16, %v140_v16 }
 0x11a   :  { %v141_v18 = vsel %vm139_vm2, %v134_v14, 0.0 }
 0x11b   :  { %150 = vadd.xlane.f32.xlu1 %v148_v17  ;;  %v149_v19 = vmul.f32 %v141_v18, %v141_v18 }
 0x11d   :  { %144 = vadd.xlane.f32.xlu0 %v141_v18 }
 0x11f   :  { %152 = vadd.xlane.f32.xlu1 %v149_v19 }
 0x1a6   :  { %v143_v27 = vpop.xlane.xlu0 %142 }
 0x1a7   :  { %v146_v28 = vmul.f32 0.0625, %v143_v27 }
 0x1a8   :  { %v151_v29 = vpop.xlane.xlu1 %150 }
 0x1a9   :  { %v156_v30 = vmul.f32 %v146_v28, %v146_v28  ;;  %v154_v31 = vmul.f32 0.0625, %v151_v29  ;;  %v160_v41 = vsub.f32 %v131_v11, %v146_v28 }
 0x1aa   :  { %v145_v32 = vpop.xlane.xlu0 %144 }
 0x1ab   :  { %v158_v33 = vsub.f32 %v154_v31, %v156_v30  ;;  %v147_v34 = vmul.f32 0.0625, %v145_v32 }
 0x1ac   :  { %v153_v35 = vpop.xlane.xlu1 %152 }
 0x1ad   :  { %v162_v36 = vadd.f32 1e-05, %v158_v33  ;;  %v157_v37 = vmul.f32 %v147_v34, %v147_v34  ;;  %v155_v38 = vmul.f32 0.0625, %v153_v35  ;;  %v161_v44 = vsub.f32 %v134_v14, %v147_v34 }
 0x1af   :  { %398 = vrsqrt.f32 %v162_v36  ;;  %v159_v39 = vsub.f32 %v155_v38, %v157_v37 }
 0x1b1   :  { %v163_v40 = vadd.f32 1e-05, %v159_v39 }
 0x1b3   :  { %400 = vrsqrt.f32 %v163_v40 }
 0x1b9   :  { %v399_v42 = vpop.eup %398 }
 0x1ba   :  { %v166_v43 = vmul.f32 %v399_v42, %v160_v41 }
 0x1bc   :  { %v168_v45 = vsel %vm139_vm2, %v166_v43, 0.0 }
 0x1bd   :  { %v401_v46 = vpop.eup %400  ;;  %170 = vst [vmem:[#allocation8] sm:$0xff] %v168_v45 }
 0x1be   :  { %v167_v47 = vmul.f32 %v401_v46, %v161_v44 }
 0x1c0   :  { %v335_v48 = vpack.c.bf16 %v167_v47, %v166_v43  ;;  %v169_v49 = vsel %vm139_vm2, %v167_v47, 0.0 }
 0x1c1   :  { %171 = vst [vmem:[#allocation8 + $0x8] sm:$0xff] %v169_v49 }
 0x1c2   :  { %374 = vmatmul.mubr.msk.bf16.vlgmr.msra.gmra.mrb[0].mxu1 %vm334_vm3, %v335_v48 }
 0x1c3   :  { %479 = shalt.err (!%p476_p0)
}
 0x1c4   :  { %s480_s16 = scalar_lea.hbm %s666_s5, 256 }
 0x1c5   :  { %p481_p1 = scmp.ne.s32.totalorder %s666_s5, %s480_s16  ;;  %p484_p2 = scmp.lt.u32.totalorder %s480_s16, %s666_s5 }
 0x1c7   :  { %p486_p3 = pnand %p484_p2, %p481_p1 }
 0x1c9   :  { %489 = shalt.err (!%p486_p3)
}
 0x1ca   :  { %298 = dma.vmem_to_hbm [thread:$0]  %s293_s8, 256, %s666_s5, [#allocation4], %s524_s1, %s524_s1, %s525_s21  }
 0x1cb   :  { %v325_v50 = vld [vmem:[%s665_s4] ss:$0 sm:$0xff]  ;;  %s530_s26 = smov [#allocation9]  }
 0x1cc   :  { %s304_s27 = sshll.u32 %s530_s26, 4  ;;  %s305_s27 = int_to_ptr.vmem [resolvable:$true] %s304_s27 }
 0x1cd   :  { %s490_s28 = scalar_lea.vmem %s305_s27, 256  ;;  %p495_p5 = scmp.lt.s32.totalorder %s305_s27, %s305_s27 }
 0x1ce   :  { %p491_p4 = scmp.ne.s32.totalorder %s305_s27, %s490_s28  ;;  %p496_p6 = scmp.lt.s32.totalorder %s490_s28, %s490_s28 }
 0x1d0   :  { %p497_p7 = por %p496_p6, %p495_p5 }
 0x1d2   :  { %p498_p8 = pnand %p497_p7, %p491_p4 }
 0x295   :  { %v278_v51 = vpop.f32.mrb[0].mxu1 }
 0x296   :  { %v279_v52 = vadd.f32 %v325_v50, %v278_v51  ;;  %v375_v53 = vpop.f32.mrb[1].mxu1 }
 0x297   :  { %v281_v54 = vpop.f32.mrb[2].mxu1 }
 0x298   :  { %285 = vst [vmem:[#allocation9] sm:$0xff] %v279_v52  ;;  %v282_v55 = vadd.f32 %v325_v50, %v281_v54  ;;  %v376_v56 = vpop.f32.mrb[3].mxu1 }
 0x29a   :  { %286 = vst [vmem:[#allocation9 + $0x8] sm:$0xff] %v282_v55 }
 0x29b   :  { %501 = shalt.err (!%p498_p8)
}
 0x29c   :  { %s502_s29 = scalar_lea.hbm %s667_s6, 256 }
 0x29d   :  { %p503_p9 = scmp.ne.s32.totalorder %s667_s6, %s502_s29  ;;  %p506_p10 = scmp.lt.u32.totalorder %s502_s29, %s667_s6 }
 0x29f   :  { %p508_p11 = pnand %p506_p10, %p503_p9 }
 0x2a1   :  { %511 = shalt.err (!%p508_p11)
}
 0x2a2   :  { %310 = dma.vmem_to_hbm [thread:$0]  %s305_s27, 256, %s667_s6, [#allocation10], %s524_s1, %s524_s1, %s525_s21  }
 0x2a3   :  { %516 = dma.done.wait [#allocation4], 256  }
 0x2a4   :  { %517 = vsyncadd [#allocation4], 4294967040 }
 0x2a5   :  { %518 = dma.done.wait [#allocation10], 256  }
 0x2a6   :  { %519 = vsyncadd [#allocation10], 4294967040 }
 0x2a7   :  { %317 = vsyncpa [#allocation3], 1 }
 0x2a8   :  { %318 = vsyncpa [#allocation6], 1 }
 0x2a9   :  { %319 = vsyncpa [#allocation4], 1 }
 0x2aa   :  { %320 = vsyncpa [#allocation10], 1 }

</bundles_post_ra>
